<compile_context>
chip_gen: v5e
topology: v5e:2x2
jax: 0.10.0
libtpu: 0.0.40
codegen_flags: <defaults>
</compile_context>

<pallas_src>
import jax
import jax.numpy as jnp
from jax.experimental import pallas as pl
from jax.experimental.pallas import tpu as pltpu


def _round_up(x: int, m: int) -> int:
    return (x + m - 1) // m * m


def _cdiv(a: int, b: int) -> int:
    return -(-a // b)


def _make_cls_kernel(tail: int):
    """tail = F % FT (static). If nonzero, the last feature tile is ragged and must be masked."""

    def kernel(x_ref, w_ref, wfc_ref, bfc_ref, o_ref, acc_ref):
        # x_ref:   (NT, FT)      input tile (any float dtype)
        # w_ref:   (1, FT)  f32  per-element conv weight (conv_w[c]/HW, flattened layout)
        # wfc_ref: (1, NC_pad)   fc weight row (zero padded to a multiple of 128)
        # bfc_ref: (1, NC_pad)   fc bias row with conv bias folded in (zero padded)
        # o_ref:   (NT, NC_pad)  f32 output tile
        # acc_ref: (NT, 1)  f32  per-batch-row running weighted spatial sum
        j = pl.program_id(1)
        last = pl.num_programs(1) - 1

        @pl.when(j == 0)
        def _init():
            acc_ref[...] = jnp.zeros_like(acc_ref)

        x = x_ref[...].astype(jnp.float32)          # f32 accumulation regardless of input dtype
        prod = x * w_ref[...]                        # (NT, FT) * (1, FT) -> (NT, FT)

        if tail:
            # Ragged final feature tile: out-of-bounds block contents are unspecified, so the
            # garbage lanes must be excluded before the reduction (select blocks NaN/Inf too).
            @pl.when(j != last)
            def _acc_full():
                acc_ref[...] += jnp.sum(prod, axis=-1, keepdims=True)

            @pl.when(j == last)
            def _acc_tail():
                lane = jax.lax.broadcasted_iota(jnp.int32, prod.shape, 1)
                masked = jnp.where(lane < tail, prod, 0.0)
                acc_ref[...] += jnp.sum(masked, axis=-1, keepdims=True)
        else:
            acc_ref[...] += jnp.sum(prod, axis=-1, keepdims=True)

        @pl.when(j == last)
        def _finalize():
            # Linear(1 -> num_classes): outer product on the VPU (contraction dim is 1 -> no MXU).
            o_ref[...] = (acc_ref[...] * wfc_ref[...] + bfc_ref[...]).astype(o_ref.dtype)

    return kernel


def classification_forward(x_nchw, conv_w, conv_b, fc_w, fc_b,
                           *, max_n_tile: int = 32,
                           target_block_bytes: int = 4 * 1024 * 1024):
    """x_nchw: (N, C, H, W); conv_w: (1, C, 1, 1); conv_b: (1,);
    fc_w: (num_classes, 1); fc_b: (num_classes,)  ->  (N, num_classes) float32."""
    N, C, H, W = x_nchw.shape
    NC = fc_w.shape[0]
    HW = H * W
    F = C * HW                                   # flattened feature axis

    # ---- batch tile: dense sublanes, and >= 2 tiles when N > 8 (keeps both v7x TCs busy) ----
    if N <= 8:
        NT = N                                   # block dim == full dim is always legal
    else:
        NT = min(max_n_tile, _round_up(max(1, N // 2), 8))
        NT = max(8, (NT // 8) * 8)               # multiple of 8 -> dense sublanes
    n_tiles = _cdiv(N, NT)

    # ---- feature tile: lane-dense, sized so (x tile + weight tile) ~ target_block_bytes ----
    itemsize = jnp.dtype(x_nchw.dtype).itemsize
    ft_cap = max(128, (target_block_bytes // (NT * itemsize + 4)) // 128 * 128)
    FT = F if F <= ft_cap else ft_cap            # full dim, or a multiple of 128
    f_tiles = _cdiv(F, FT)
    tail = F % FT if f_tiles > 1 else 0          # ragged last tile only when tiled

    NC_pad = _round_up(NC, 128)                  # lane-dense output store

    # ---- parameter preprocessing (tiny arrays; the big input x is only reshaped, never padded) ----
    x2 = x_nchw.reshape(N, F)                    # contiguous reshape: free, no extra HBM pass

    inv_hw = 1.0 / float(HW)
    wc = conv_w.reshape(C).astype(jnp.float32) * inv_hw          # (C,)  1/HW folded in
    w_row = jnp.repeat(wc, HW).reshape(1, F)                     # (1, F) per-element weight

    fcw = fc_w.reshape(NC).astype(jnp.float32)
    wfc = jnp.zeros((1, NC_pad), jnp.float32).at[0, :NC].set(fcw)
    # conv bias folded into the fc bias:  (pooled + b_conv) @ fc_w + fc_b
    bfc = jnp.zeros((1, NC_pad), jnp.float32).at[0, :NC].set(
        fc_b.astype(jnp.float32) + conv_b.astype(jnp.float32)[0] * fcw)

    out = pl.pallas_call(
        _make_cls_kernel(tail),
        out_shape=jax.ShapeDtypeStruct((n_tiles * NT, NC_pad), jnp.float32),
        grid=(n_tiles, f_tiles),
        in_specs=[
            pl.BlockSpec((NT, FT), lambda i, j: (i, j)),                     # x (streamed)
            pl.BlockSpec((1, FT), lambda i, j: (0, j)),                      # conv weight row
            pl.BlockSpec(memory_space=pltpu.MemorySpace.VMEM),               # fc weight (resident)
            pl.BlockSpec(memory_space=pltpu.MemorySpace.VMEM),               # fc bias   (resident)
        ],
        out_specs=pl.BlockSpec((NT, NC_pad), lambda i, j: (i, 0)),
        scratch_shapes=[pltpu.VMEM((NT, 1), jnp.float32)],
        compiler_params=pltpu.CompilerParams(
            dimension_semantics=("parallel", "arbitrary")),
    )(x2, w_row, wfc, bfc)

    return out[:N, :NC]


def _reference_forward(x, conv_w, conv_b, fc_w, fc_b):
    # Pure-JAX reference mirroring the PyTorch module exactly.
    x = x.astype(jnp.float32)
    y = jnp.einsum("nchw,oc->nohw", x, conv_w[:, :, 0, 0]) + conv_b[None, :, None, None]
    pooled = jnp.mean(y, axis=(2, 3))            # (N, 1)  == pool + flatten
    return pooled @ fc_w.T + fc_b[None, :]       # (N, num_classes)


if __name__ == "__main__":
    key = jax.random.PRNGKey(0)
    kx, k1, k2, k3, k4 = jax.random.split(key, 5)

    # ---------- test 1: module defaults (in_chans=3, num_classes=1000), single feature tile ----------
    N, C, H, W = 2, 3, 16, 16
    NUM_CLASSES = 1000

    x = jax.random.normal(kx, (N, C, H, W), dtype=jnp.float32)
    conv_w = jax.random.normal(k1, (1, C, 1, 1), dtype=jnp.float32) * 0.2
    conv_b = jax.random.normal(k2, (1,), dtype=jnp.float32) * 0.1
    fc_w = jax.random.normal(k3, (NUM_CLASSES, 1), dtype=jnp.float32) * 0.2
    fc_b = jax.random.normal(k4, (NUM_CLASSES,), dtype=jnp.float32) * 0.1

    out = jax.block_until_ready(classification_forward(x, conv_w, conv_b, fc_w, fc_b))
    ref = _reference_forward(x, conv_w, conv_b, fc_w, fc_b)
    assert out.shape == (N, NUM_CLASSES), out.shape
    assert jnp.allclose(out, ref, rtol=1e-5, atol=1e-5), float(jnp.max(jnp.abs(out - ref)))

    # ---------- test 2: multi batch-tile + ragged feature tail + padded class axis ----------
    N2, C2, H2, W2, NC2 = 10, 3, 15, 15, 13
    x2 = jax.random.normal(kx, (N2, C2, H2, W2), dtype=jnp.float32)
    cw2 = jax.random.normal(k1, (1, C2, 1, 1), dtype=jnp.float32) * 0.2
    cb2 = jax.random.normal(k2, (1,), dtype=jnp.float32) * 0.1
    fw2 = jax.random.normal(k3, (NC2, 1), dtype=jnp.float32) * 0.2
    fb2 = jax.random.normal(k4, (NC2,), dtype=jnp.float32) * 0.1
    out2 = jax.block_until_ready(
        classification_forward(x2, cw2, cb2, fw2, fb2,
                               max_n_tile=8, target_block_bytes=4096))
    ref2 = _reference_forward(x2, cw2, cb2, fw2, fb2)
    assert out2.shape == (N2, NC2), out2.shape
    assert jnp.allclose(out2, ref2, rtol=1e-5, atol=1e-5), float(jnp.max(jnp.abs(out2 - ref2)))

    # ---------- test 3: bf16 input (halves HBM traffic; kernel accumulates in f32) ----------
    xb = x.astype(jnp.bfloat16)
    out3 = jax.block_until_ready(classification_forward(xb, conv_w, conv_b, fc_w, fc_b))
    ref3 = _reference_forward(xb, conv_w, conv_b, fc_w, fc_b)
    assert jnp.allclose(out3, ref3, rtol=2e-2, atol=2e-2), float(jnp.max(jnp.abs(out3 - ref3)))

    print("KERNEL_OK")
</pallas_src>

<mosaic_0001>
module attributes {stable_mosaic.version = 11 : i64} {
  func.func @kernel(%arg0: i32, %arg1: i32, %arg2: memref<2x768xf32, #tpu.memory_space<vmem>>, %arg3: memref<1x768xf32, #tpu.memory_space<vmem>>, %arg4: memref<1x1024xf32, #tpu.memory_space<vmem>>, %arg5: memref<1x1024xf32, #tpu.memory_space<vmem>>, %arg6: memref<2x1024xf32, #tpu.memory_space<vmem>>, %arg7: memref<2x1xf32, #tpu.memory_space<vmem>>) attributes {dimension_semantics = [#tpu.dimension_semantics<parallel>, #tpu.dimension_semantics<arbitrary>], iteration_bounds = array<i64: 1, 1>, scalar_prefetch = 0 : i64, scratch_operands = 1 : i64, tpu.core_type = #tpu.core_type<tc>, window_params = [{transform_indices = @transform_0, window_bounds = array<i64: 2, 768>}, {transform_indices = @transform_1, window_bounds = array<i64: 1, 768>}, {pipeline_mode = #tpu.pipeline_mode<synchronous>, transform_indices = @transform_2, window_bounds = array<i64: 1, 1024>}, {pipeline_mode = #tpu.pipeline_mode<synchronous>, transform_indices = @transform_3, window_bounds = array<i64: 1, 1024>}, {transform_indices = @transform_4, window_bounds = array<i64: 2, 1024>}]} {
    %c0_i32 = arith.constant 0 : i32
    %0 = arith.cmpi eq, %arg1, %c0_i32 : i32
    %1 = arith.extui %0 : i1 to i32
    %c0_i32_0 = arith.constant 0 : i32
    %2 = arith.cmpi ne, %1, %c0_i32_0 : i32
    scf.if %2 {
      %cst_10 = arith.constant 0.000000e+00 : f32
      %15 = vector.broadcast %cst_10 : f32 to vector<2x1xf32>
      %c0_11 = arith.constant 0 : index
      %c0_12 = arith.constant 0 : index
      %16 = vector.load %arg7[%c0_11, %c0_12] : memref<2x1xf32, #tpu.memory_space<vmem>>, vector<2x1xf32>
      tpu.vector_store %arg7[%c0_11, %c0_12], %15 {strides = array<i32>} : memref<2x1xf32, #tpu.memory_space<vmem>>, vector<2x1xf32>,
    } else {
    }
    %c0 = arith.constant 0 : index
    %c0_1 = arith.constant 0 : index
    %3 = vector.load %arg2[%c0, %c0_1] : memref<2x768xf32, #tpu.memory_space<vmem>>, vector<2x768xf32>
    %c0_2 = arith.constant 0 : index
    %c0_3 = arith.constant 0 : index
    %4 = vector.load %arg3[%c0_2, %c0_3] : memref<1x768xf32, #tpu.memory_space<vmem>>, vector<1x768xf32>
    %5 = vector.broadcast %4 : vector<1x768xf32> to vector<2x768xf32>
    %6 = arith.mulf %3, %5 : vector<2x768xf32>
    %c0_4 = arith.constant 0 : index
    %c0_5 = arith.constant 0 : index
    %7 = vector.load %arg7[%c0_4, %c0_5] : memref<2x1xf32, #tpu.memory_space<vmem>>, vector<2x1xf32>
    %cst = arith.constant dense<0.000000e+00> : vector<2xf32>
    %8 = vector.multi_reduction <add>, %6, %cst [1] : vector<2x768xf32> to vector<2xf32>
    %9 = vector.shape_cast %8 : vector<2xf32> to vector<2x1xf32>
    %10 = arith.addf %7, %9 : vector<2x1xf32>
    %c0_6 = arith.constant 0 : index
    %c0_7 = arith.constant 0 : index
    %11 = vector.load %arg7[%c0_6, %c0_7] : memref<2x1xf32, #tpu.memory_space<vmem>>, vector<2x1xf32>
    tpu.vector_store %arg7[%c0_6, %c0_7], %10 {strides = array<i32>} : memref<2x1xf32, #tpu.memory_space<vmem>>, vector<2x1xf32>,
    %c0_i32_8 = arith.constant 0 : i32
    %12 = arith.cmpi eq, %arg1, %c0_i32_8 : i32
    %13 = arith.extui %12 : i1 to i32
    %c0_i32_9 = arith.constant 0 : i32
    %14 = arith.cmpi ne, %13, %c0_i32_9 : i32
    scf.if %14 {
      %c0_10 = arith.constant 0 : index
      %c0_11 = arith.constant 0 : index
      %15 = vector.load %arg7[%c0_10, %c0_11] : memref<2x1xf32, #tpu.memory_space<vmem>>, vector<2x1xf32>
      %c0_12 = arith.constant 0 : index
      %c0_13 = arith.constant 0 : index
      %16 = vector.load %arg4[%c0_12, %c0_13] : memref<1x1024xf32, #tpu.memory_space<vmem>>, vector<1x1024xf32>
      %17 = vector.broadcast %15 : vector<2x1xf32> to vector<2x1024xf32>
      %18 = vector.broadcast %16 : vector<1x1024xf32> to vector<2x1024xf32>
      %19 = arith.mulf %17, %18 : vector<2x1024xf32>
      %c0_14 = arith.constant 0 : index
      %c0_15 = arith.constant 0 : index
      %20 = vector.load %arg5[%c0_14, %c0_15] : memref<1x1024xf32, #tpu.memory_space<vmem>>, vector<1x1024xf32>
      %21 = vector.broadcast %20 : vector<1x1024xf32> to vector<2x1024xf32>
      %22 = arith.addf %19, %21 : vector<2x1024xf32>
      %c0_16 = arith.constant 0 : index
      %c0_17 = arith.constant 0 : index
      %23 = vector.load %arg6[%c0_16, %c0_17] : memref<2x1024xf32, #tpu.memory_space<vmem>>, vector<2x1024xf32>
      tpu.vector_store %arg6[%c0_16, %c0_17], %22 {strides = array<i32>} : memref<2x1024xf32, #tpu.memory_space<vmem>>, vector<2x1024xf32>,
    } else {
    }
    return
  }
  func.func @transform_0(%arg0: i32, %arg1: i32) -> (i32, i32) {
    %c0_i32 = arith.constant 0 : i32
    return %arg0, %arg1 : i32, i32
  }
  func.func @transform_1(%arg0: i32, %arg1: i32) -> (i32, i32) {
    %c0_i32 = arith.constant 0 : i32
    %c0_i32_0 = arith.constant 0 : i32
    return %c0_i32, %arg1 : i32, i32
  }
  func.func @transform_2(%arg0: i32, %arg1: i32) -> (i32, i32) {
    %c0_i32 = arith.constant 0 : i32
    %c0_i32_0 = arith.constant 0 : i32
    %c0_i32_1 = arith.constant 0 : i32
    return %c0_i32, %c0_i32_0 : i32, i32
  }
  func.func @transform_3(%arg0: i32, %arg1: i32) -> (i32, i32) {
    %c0_i32 = arith.constant 0 : i32
    %c0_i32_0 = arith.constant 0 : i32
    %c0_i32_1 = arith.constant 0 : i32
    return %c0_i32, %c0_i32_0 : i32, i32
  }
  func.func @transform_4(%arg0: i32, %arg1: i32) -> (i32, i32) {
    %c0_i32 = arith.constant 0 : i32
    %c0_i32_0 = arith.constant 0 : i32
    return %arg0, %c0_i32 : i32, i32
  }
}

</mosaic_0001>

<bundles_post_ra>
// kernel: tpu_custom_call.1
= control target key start
LH: loop header
LB: loop body
LE: loop exit
PB: predicated region body
PF: predicated region fallthrough
CT: control target
= control target key end

     0   :  { %9 = vsyncpa [#allocation4], 0  ;;  %s443_s0 = inlined_call_operand.hbm [shape: f32[2,768], index: 0, kind: input, shape index: {}]   ;;  %s444_s1 = inlined_call_operand.hbm [shape: f32[1,768], index: 1, kind: input, shape index: {}]   ;;  %s445_s2 = inlined_call_operand.hbm [shape: f32[1,1024], index: 2, kind: input, shape index: {}]   ;;  %s446_s3 = inlined_call_operand.hbm [shape: f32[1,1024], index: 3, kind: input, shape index: {}]   ;;  %s447_s4 = inlined_call_operand.hbm [shape: f32[2,1024], index: 4, kind: output, shape index: {}]  }
   0x1   :  { %10 = vsyncpa [#allocation7], 0 }
   0x2   :  { %11 = vsyncpa [#allocation10], 0  ;;  %s29_s17 = sshll.u32 %s444_s1, 4  ;;  %s30_s17 = int_to_ptr.hbm [resolvable:$true] %s29_s17 }
   0x3   :  { %12 = vsyncpa [#allocation5], 0  ;;  %s378_s18 = smov [#allocation6]   ;;  %s18_s22 = sshll.u32 %s443_s0, 4  ;;  %s19_s22 = int_to_ptr.hbm [resolvable:$true] %s18_s22 }
   0x4   :  { %s31_s19 = sshll.u32 %s378_s18, 4  ;;  %s379_s23 = smov [#allocation3]   ;;  %s32_s19 = int_to_ptr.vmem [resolvable:$true] %s31_s19 }
   0x5   :  { %34 = dma.hbm_to_vmem [thread:$0]  %s30_s17, 96, %s32_s19, [#allocation7]  }
   0x6   :  { %s20_s24 = sshll.u32 %s379_s23, 4  ;;  %s40_s27 = sshll.u32 %s445_s2, 4  ;;  %s21_s24 = int_to_ptr.vmem [resolvable:$true] %s20_s24  ;;  %s41_s27 = int_to_ptr.hbm [resolvable:$true] %s40_s27 }
   0x7   :  { %23 = dma.hbm_to_vmem [thread:$0]  %s19_s22, 192, %s21_s24, [#allocation4]  }
   0x8   :  { %s51_s29 = sshll.u32 %s446_s3, 4  ;;  %s380_s30 = smov [#allocation8]   ;;  %s52_s29 = int_to_ptr.hbm [resolvable:$true] %s51_s29 }
   0x9   :  { %s42_s5 = sshll.u32 %s380_s30, 4  ;;  %s381_s0 = smov [#allocation9]   ;;  %s43_s5 = int_to_ptr.vmem [resolvable:$true] %s42_s5 }
   0xa   :  { %45 = dma.hbm_to_vmem [thread:$0]  %s41_s27, 128, %s43_s5, [#allocation7]  }
   0xb   :  { %s53_s6 = sshll.u32 %s381_s0, 4  ;;  %s54_s6 = int_to_ptr.vmem [resolvable:$true] %s53_s6 }
   0xc   :  { %56 = dma.hbm_to_vmem [thread:$0]  %s52_s29, 128, %s54_s6, [#allocation10]  }
   0xd   :  { %370 = dma.done.wait [#allocation4], 192  }
   0xe   :  { %371 = vsyncadd [#allocation4], 4294967104 }
   0xf   :  { %372 = dma.done.wait [#allocation7], 224  }
  0x10   :  { %373 = vsyncadd [#allocation7], 4294967072 }
  0x11   :  { %374 = dma.done.wait [#allocation10], 128  }
  0x12   :  { %375 = vsyncadd [#allocation10], 4294967168  ;;  %vm77_vm0 = vcmask 1024   ;;  %v382_v0 = vmov 0.0   ;;  %v81_v1 = vld [vmem:[#allocation6] sm:$0x3f] }
  0x13   :  { %78 = vst.msk [vmem:[#allocation2] sm:$0x3] %vm77_vm0, %v382_v0  ;;  %v83_v2 = vperm.slane %v81_v1, 0  ;;  %v84_v3 = vperm.slane %v81_v1, 1  ;;  %v85_v4 = vperm.slane %v81_v1, 2  ;;  %v86_v5 = vperm.slane %v81_v1, 3 }
  0x14   :  { %v87_v6 = vperm.slane %v81_v1, 4  ;;  %v88_v7 = vperm.slane %v81_v1, 5  ;;  %vm93_vm1 = vcmask 1041408   ;;  %vm95_vm2 = vcmask 1045508   ;;  %v79_v11 = vld [vmem:[#allocation3] sm:$0xff]  ;;  %v142_v42 = vld [vmem:[#allocation8] sm:$0xff] }
  0x15   :  { %v89_v8 = vrot.slane %v84_v3, 6  ;;  %v90_v9 = vrot.slane %v85_v4, 4  ;;  %v91_v10 = vrot.slane %v86_v5, 2  ;;  %vm97_vm3 = vcmask 1043456   ;;  %v80_v12 = vld [vmem:[#allocation3 + $0x8] sm:$0xf] }
  0x16   :  { %v92_v13 = vrot.slane %v88_v7, 6  ;;  %v383_v37 = vmov 0   ;;  %v173_v43 = vld [vmem:[#allocation9] sm:$0xff]  ;;  %v150_v44 = vperm.slane %v142_v42, 1  ;;  %v151_v45 = vperm.slane %v142_v42, 2  ;;  %s384_s2 = smov [#allocation11]  }
  0x17   :  { %v94_v14 = vsel %vm93_vm1, %v83_v2, %v89_v8  ;;  %v96_v15 = vsel %vm95_vm2, %v90_v9, %v91_v10  ;;  %249 = vset.pattern.permute.xlu0 %v383_v37  ;;  %v152_v46 = vperm.slane %v142_v42, 3  ;;  %v154_v47 = vperm.slane %v142_v42, 5  ;;  %s228_s3 = sshll.u32 %s384_s2, 4  ;;  %s230_s9 = sshll.u32 %s447_s4, 4  ;;  %s229_s3 = int_to_ptr.vmem [resolvable:$true] %s228_s3  ;;  %s231_s9 = int_to_ptr.hbm [resolvable:$true] %s230_s9 }
  0x18   :  { %v98_v16 = vsel %vm97_vm3, %v94_v14, %v96_v15  ;;  %v99_v17 = vsel %vm93_vm1, %v87_v6, %v92_v13  ;;  %v155_v48 = vperm.slane %v142_v42, 6  ;;  %v156_v49 = vperm.slane %v142_v42, 7 }
  0x19   :  { %v102_v18 = vmul.f32 %v98_v16, %v79_v11  ;;  %v103_v19 = vmul.f32 %v99_v17, %v80_v12  ;;  %v149_v50 = vperm.slane %v142_v42, 0  ;;  %v153_v51 = vperm.slane %v142_v42, 4 }
  0x1a   :  { %v104_v38 = vld [vmem:[#allocation2] sm:$0x3]  ;;  %v176_v52 = vperm.slane %v173_v43, 1  ;;  %v177_v53 = vperm.slane %v173_v43, 2  ;;  %v178_v54 = vperm.slane %v173_v43, 3  ;;  %v180_v55 = vperm.slane %v173_v43, 5 }
  0x1b   :  { %107 = vst [vmem:[#allocation1] ss:$4 sm:$0xff] %v102_v18  ;;  %v175_v57 = vperm.slane %v173_v43, 0  ;;  %v179_v58 = vperm.slane %v173_v43, 4  ;;  %v181_v59 = vperm.slane %v173_v43, 6  ;;  %v182_v60 = vperm.slane %v173_v43, 7 }
  0x1c   :  { %109 = vst [vmem:[#allocation1 + $0x20] ss:$4 sm:$0xff] %v103_v19 }
  0x22   :  { %v110_v20 = vld.sshfl [vmem:[#allocation1] sm:$0xff pattern:$0x73625140]  ;;  %v111_v21 = vld.sshfl [vmem:[#allocation1 + $0x8] sm:$0xff pattern:$0x73625140] }
  0x23   :  { %v112_v22 = vld.sshfl [vmem:[#allocation1 + $0x10] sm:$0xff pattern:$0x73625140]  ;;  %v113_v23 = vld.sshfl [vmem:[#allocation1 + $0x18] sm:$0xff pattern:$0x73625140] }
  0x24   :  { %v122_v24 = vsel %vm93_vm1, %v110_v20, 0.0  ;;  %v123_v25 = vsel %vm93_vm1, %v111_v21, 0.0  ;;  %v125_v26 = vsel %vm93_vm1, %v112_v22, 0.0  ;;  %v114_v27 = vld.sshfl [vmem:[#allocation1 + $0x20] sm:$0xff pattern:$0x73625140] }
  0x25   :  { %v124_v28 = vadd.f32 %v123_v25, %v122_v24  ;;  %v127_v29 = vsel %vm93_vm1, %v113_v23, 0.0  ;;  %v115_v30 = vld.sshfl [vmem:[#allocation1 + $0x28] sm:$0xff pattern:$0x73625140]  ;;  %v129_v32 = vsel %vm93_vm1, %v114_v27, 0.0 }
  0x26   :  { %v131_v34 = vsel %vm93_vm1, %v115_v30, 0.0 }
  0x27   :  { %v126_v31 = vadd.f32 %v125_v26, %v124_v28 }
  0x29   :  { %v128_v33 = vadd.f32 %v127_v29, %v126_v31 }
  0x2b   :  { %v130_v35 = vadd.f32 %v129_v32, %v128_v33 }
  0x2d   :  { %v132_v36 = vadd.f32 %v131_v34, %v130_v35 }
  0x2f   :  { %133 = vadd.xlane.f32.xlu0 %v132_v36 }
  0xa2   :  { %v134_v39 = vpop.xlane.xlu0 %133 }
  0xa3   :  { %v135_v40 = vadd.f32 %v134_v39, %v104_v38 }
  0xa5   :  { %137 = vst.msk [vmem:[#allocation2] sm:$0x3] %vm77_vm0, %v135_v40 }
  0xac   :  { %v141_v41 = vld [vmem:[#allocation2] sm:$0x3] }
  0xad   :  { %145 = vperm.xlu0 %249, %v141_v41  }
 0x11f   :  { %v146_v56 = vpop.permute.xlu0 %145 }
 0x120   :  { %v166_v61 = vmul.f32 %v150_v44, %v146_v56  ;;  %v167_v62 = vmul.f32 %v151_v45, %v146_v56  ;;  %v168_v63 = vmul.f32 %v152_v46, %v146_v56  ;;  %v170_v0 = vmul.f32 %v154_v47, %v146_v56 }
 0x121   :  { %v171_v1 = vmul.f32 %v155_v48, %v146_v56  ;;  %v172_v2 = vmul.f32 %v156_v49, %v146_v56  ;;  %v165_v3 = vmul.f32 %v149_v50, %v146_v56  ;;  %v169_v4 = vmul.f32 %v153_v51, %v146_v56 }
 0x122   :  { %v192_v5 = vadd.f32 %v176_v52, %v166_v61  ;;  %v193_v6 = vadd.f32 %v177_v53, %v167_v62  ;;  %v194_v7 = vadd.f32 %v178_v54, %v168_v63  ;;  %v196_v8 = vadd.f32 %v180_v55, %v170_v0 }
 0x123   :  { %v191_v9 = vadd.f32 %v175_v57, %v165_v3  ;;  %v195_v10 = vadd.f32 %v179_v58, %v169_v4  ;;  %v197_v11 = vadd.f32 %v181_v59, %v171_v1  ;;  %v198_v12 = vadd.f32 %v182_v60, %v172_v2 }
 0x124   :  { %v207_v13 = vrot.slane %v192_v5, 6  ;;  %v208_v14 = vrot.slane %v193_v6, 4  ;;  %v209_v15 = vrot.slane %v194_v7, 2  ;;  %v210_v16 = vrot.slane %v196_v8, 6 }
 0x125   :  { %v211_v17 = vrot.slane %v197_v11, 4  ;;  %v212_v18 = vrot.slane %v198_v12, 2 }
 0x126   :  { %v213_v19 = vsel %vm93_vm1, %v191_v9, %v207_v13  ;;  %v214_v20 = vsel %vm95_vm2, %v208_v14, %v209_v15  ;;  %v216_v21 = vsel %vm93_vm1, %v195_v10, %v210_v16 }
 0x127   :  { %v215_v22 = vsel %vm97_vm3, %v213_v19, %v214_v20  ;;  %v217_v23 = vsel %vm95_vm2, %v211_v17, %v212_v18 }
 0x128   :  { %v218_v24 = vsel %vm97_vm3, %v216_v21, %v217_v23  ;;  %221 = vst [vmem:[#allocation11] sm:$0xff] %v215_v22 }
 0x129   :  { %222 = vst [vmem:[#allocation11 + $0x8] sm:$0xff] %v218_v24 }
 0x12a   :  { %233 = dma.vmem_to_hbm [thread:$0]  %s229_s3, 256, %s231_s9, [#allocation5]  }
 0x12b   :  { %376 = dma.done.wait [#allocation5], 256  }
 0x12c   :  { %377 = vsyncadd [#allocation5], 4294967040 }
 0x12d   :  { %238 = vsyncpa [#allocation4], 1 }
 0x12e   :  { %239 = vsyncpa [#allocation7], 1 }
 0x12f   :  { %240 = vsyncpa [#allocation10], 1 }
 0x130   :  { %241 = vsyncpa [#allocation5], 1 }

</bundles_post_ra>
